<compile_context>
chip_gen: v6e
topology: v6e:2x2x1
jax: 0.10.0
libtpu: 0.0.40
codegen_flags: <defaults>
</compile_context>

<pallas_src>
import math

import jax
import jax.numpy as jnp
from jax import lax
from jax.experimental import pallas as pl
from jax.experimental.pallas import tpu as pltpu


def one_hidden_kernel(x_ref, w_ref, c_ref, o_ref):
    # x_ref : (TM, D)   w_ref : (TH, D)   c_ref : (1, TH)   o_ref : (1, TM)
    # MXU matmul with transposed RHS (contract x dim 1 with w dim 1) -> (TM, TH) f32.
    h = lax.dot_general(
        x_ref[...],
        w_ref[...],
        dimension_numbers=(((1,), (1,)), ((), ())),
        preferred_element_type=jnp.float32,
    )
    # leaky_relu with default negative_slope=0.01.
    h = jnp.where(h > 0, h, 0.01 * h)
    # Second contraction on the MXU, lane-dense result: (1, TH) x (TM, TH) -> (1, TM).
    partial = lax.dot_general(
        c_ref[...],
        h,
        dimension_numbers=(((1,), (1,)), ((), ())),
        preferred_element_type=jnp.float32,
    )
    # Accumulate over hidden-dim tiles (output block is resident across axis 1).
    @pl.when(pl.program_id(1) == 0)
    def _():
        o_ref[...] = jnp.zeros_like(o_ref)

    o_ref[...] += partial


def _vmem_budget():
    """Per-generation VMEM sizing: (tile-selection budget, scoped vmem limit)."""
    cap = 64 * 1024 * 1024  # conservative fallback: v7x per-TensorCore VMEM
    try:
        cap = int(pltpu.get_tpu_info().vmem_capacity_bytes)
    except Exception:
        pass
    # ~70% for our own tile math, ~85% as the Mosaic scoped-VMEM limit:
    #   v7x  (64 MiB):  ~45 MiB budget / ~54 MiB limit
    #   v5e/v6e (128 MiB): ~90 MiB budget / ~109 MiB limit
    return int(cap * 0.70), int(cap * 0.85)


def _choose_tiles(n, in_dim, hidden_dim, budget_bytes):
    """Pick (TM, TH): batch tile and hidden tile.

    TH == hidden_dim when the whole (hidden, in) weight (double-buffered) fits in
    half the budget; otherwise tile hidden in lane-aligned (multiple of 128) chunks.
    TM is sized in bytes (no hard row cap), accounting for the double-buffered x
    and out tiles AND the (TM, TH) f32 intermediate h.
    """
    itemsize = 4  # f32

    def w_bytes(th):
        # weight tile + const tile; count 2x for the pipeline's double-buffering.
        return 2 * (th * in_dim + th) * itemsize

    if w_bytes(hidden_dim) <= budget_bytes // 2:
        th = hidden_dim
    else:
        per_h_row = 2 * (in_dim + 1) * itemsize
        th = ((budget_bytes // 2) // per_h_row) // 128 * 128
        th = max(128, min(th, pl.cdiv(hidden_dim, 128) * 128))
    # TODO(synk): if even a (128, in_dim) weight tile exceeds VMEM (enormous in_dim),
    # an in_dim (K) reduction axis with a deferred leaky_relu would be required.

    fixed = w_bytes(th)
    per_row = (
        2 * in_dim      # x row, double-buffered
        + 2 * 1         # output slot, double-buffered
        + 2 * th        # (TM, TH) intermediate h (+ headroom for the h*c operands)
    ) * itemsize
    avail = max(budget_bytes - fixed, 8 * per_row)
    tm_vmem = max(8, (avail // per_row) // 8 * 8)
    # Target roughly an 8 MiB x tile so the ~0.35 us/step overhead is amortized.
    tm_target = max(8, (8 * 1024 * 1024) // (in_dim * itemsize) // 8 * 8)
    n_pad8 = pl.cdiv(n, 8) * 8
    tm = max(8, min(tm_vmem, tm_target, n_pad8))
    return tm, th


def one_hidden_net(x, w, const):
    """x: (N, in_dim) f32, w: (hidden_dim, in_dim) f32 (PyTorch layout),
    const: (1, hidden_dim) f32.  Returns (N,) f32 == OneHiddenNet.forward(x).view(-1)."""
    n, in_dim = x.shape
    hidden_dim, in_dim_w = w.shape
    assert in_dim_w == in_dim
    assert const.shape == (1, hidden_dim)

    x = x.astype(jnp.float32)
    w = w.astype(jnp.float32)
    const = const.astype(jnp.float32)

    budget_bytes, vmem_limit = _vmem_budget()
    tm, th = _choose_tiles(n, in_dim, hidden_dim, budget_bytes)

    # Pad batch to a multiple of TM (zero rows: leaky_relu(0)=0, dot with c = 0).
    n_pad = pl.cdiv(n, tm) * tm
    if n_pad != n:
        x = jnp.pad(x, ((0, n_pad - n), (0, 0)))
    # Pad hidden to a multiple of TH (zero weight rows / zero const cols contribute 0).
    h_pad = pl.cdiv(hidden_dim, th) * th
    if h_pad != hidden_dim:
        w = jnp.pad(w, ((0, h_pad - hidden_dim), (0, 0)))
        const = jnp.pad(const, ((0, 0), (0, h_pad - hidden_dim)))

    n_tiles = n_pad // tm
    h_tiles = h_pad // th
    grid = (n_tiles, h_tiles)

    cost = pl.CostEstimate(
        flops=2 * n_pad * in_dim * h_pad + 2 * n_pad * h_pad,
        transcendentals=0,
        bytes_accessed=(n_pad * in_dim + h_pad * in_dim + h_pad + n_pad) * 4,
    )

    out = pl.pallas_call(
        one_hidden_kernel,
        out_shape=jax.ShapeDtypeStruct((n_tiles, tm), jnp.float32),
        grid_spec=pltpu.PrefetchScalarGridSpec(
            num_scalar_prefetch=0,
            grid=grid,
            in_specs=[
                # x streams tile-by-tile over the batch axis (constant across hidden axis).
                pl.BlockSpec((tm, in_dim), lambda i, j: (i, 0)),
                # weight / const tiles are indexed only by the hidden axis; when
                # h_tiles == 1 they stay fully VMEM-resident across all batch tiles.
                pl.BlockSpec((th, in_dim), lambda i, j: (j, 0)),
                pl.BlockSpec((1, th), lambda i, j: (0, j)),
            ],
            # Same output block across the hidden axis -> VMEM-resident accumulator.
            out_specs=pl.BlockSpec((1, tm), lambda i, j: (i, 0)),
        ),
        compiler_params=pltpu.CompilerParams(
            # Batch tiles are independent (megacore-parallel); hidden is a reduction.
            dimension_semantics=("parallel", "arbitrary"),
            vmem_limit_bytes=vmem_limit,
        ),
        cost_estimate=cost,
    )(x, w, const)

    # (n_tiles, tm) rows are consecutive batch chunks -> flatten and trim padding.
    return out.reshape(-1)[:n]


def reference(x, w, const):
    h = x @ w.T
    h = jnp.where(h > 0, h, 0.01 * h)
    return (h @ const.T).reshape(-1)


if __name__ == "__main__":
    # Small shapes consistent with the module: batch=8, in_dim=16, hidden_dim=32
    batch, in_dim, hidden_dim = 8, 16, 32
    assert hidden_dim % 2 == 0

    key = jax.random.PRNGKey(0)
    kx, kw = jax.random.split(key)

    x = jax.random.normal(kx, (batch, in_dim), dtype=jnp.float32)

    # nn.Linear default init: U(-1/sqrt(in_dim), 1/sqrt(in_dim)); weight shape (hidden, in)
    bound = 1.0 / math.sqrt(in_dim)
    w = jax.random.uniform(
        kw, (hidden_dim, in_dim), dtype=jnp.float32, minval=-bound, maxval=bound
    )

    # const buffer: first half +1/sqrt(hidden), second half -1/sqrt(hidden)
    half = hidden_dim // 2
    const = jnp.concatenate(
        [
            jnp.full((1, half), 1.0 / math.sqrt(hidden_dim), dtype=jnp.float32),
            jnp.full((1, half), -1.0 / math.sqrt(hidden_dim), dtype=jnp.float32),
        ],
        axis=1,
    )

    out = jax.block_until_ready(one_hidden_net(x, w, const))
    ref = reference(x, w, const)

    assert out.shape == (batch,), out.shape
    assert jnp.allclose(out, ref, atol=1e-5, rtol=1e-5), (out, ref)

    # Also exercise a batch that does not divide the tile size (padding path).
    x2 = jax.random.normal(jax.random.PRNGKey(1), (13, in_dim), dtype=jnp.float32)
    out2 = jax.block_until_ready(one_hidden_net(x2, w, const))
    assert out2.shape == (13,)
    assert jnp.allclose(out2, reference(x2, w, const), atol=1e-5, rtol=1e-5)

    print("KERNEL_OK")
</pallas_src>

<mosaic_0001>
module attributes {stable_mosaic.version = 11 : i64} {
  func.func @one_hidden_kernel(%arg0: i32, %arg1: i32, %arg2: memref<8x16xf32, #tpu.memory_space<vmem>>, %arg3: memref<32x16xf32, #tpu.memory_space<vmem>>, %arg4: memref<1x32xf32, #tpu.memory_space<vmem>>, %arg5: memref<1x8xf32, #tpu.memory_space<vmem>>) attributes {dimension_semantics = [#tpu.dimension_semantics<parallel>, #tpu.dimension_semantics<arbitrary>], iteration_bounds = array<i64: 1, 1>, scalar_prefetch = 0 : i64, scratch_operands = 0 : i64, tpu.core_type = #tpu.core_type<tc>, window_params = [{transform_indices = @transform_0, window_bounds = array<i64: 8, 16>}, {transform_indices = @transform_1, window_bounds = array<i64: 32, 16>}, {transform_indices = @transform_2, window_bounds = array<i64: 1, 32>}, {transform_indices = @transform_3, window_bounds = array<i64: 1, 8>}]} {
    %c0 = arith.constant 0 : index
    %c0_0 = arith.constant 0 : index
    %0 = vector.load %arg2[%c0, %c0_0] : memref<8x16xf32, #tpu.memory_space<vmem>>, vector<8x16xf32>
    %c0_1 = arith.constant 0 : index
    %c0_2 = arith.constant 0 : index
    %1 = vector.load %arg3[%c0_1, %c0_2] : memref<32x16xf32, #tpu.memory_space<vmem>>, vector<32x16xf32>
    %cst = arith.constant dense<0.000000e+00> : vector<8x32xf32>
    %2 = tpu.matmul %0, %1, %cst {dimension_numbers = #tpu.dot_dimension_numbers<[1], [1], [0], [0], [0, 0, 1, 0], [], []>} : vector<8x16xf32>, vector<32x16xf32>, vector<8x32xf32> -> vector<8x32xf32>
    %cst_3 = arith.constant 0.000000e+00 : f32
    %3 = vector.broadcast %cst_3 : f32 to vector<8x32xf32>
    %4 = arith.cmpf ogt, %2, %3 : vector<8x32xf32>
    %cst_4 = arith.constant 0.00999999977 : f32
    %5 = vector.broadcast %cst_4 : f32 to vector<8x32xf32>
    %6 = arith.mulf %5, %2 : vector<8x32xf32>
    %7 = arith.select %4, %2, %6 : vector<8x32xi1>, vector<8x32xf32>
    %c0_5 = arith.constant 0 : index
    %c0_6 = arith.constant 0 : index
    %8 = vector.load %arg4[%c0_5, %c0_6] : memref<1x32xf32, #tpu.memory_space<vmem>>, vector<1x32xf32>
    %cst_7 = arith.constant dense<0.000000e+00> : vector<1x8xf32>
    %9 = tpu.matmul %8, %7, %cst_7 {dimension_numbers = #tpu.dot_dimension_numbers<[1], [1], [0], [0], [0, 0, 1, 0], [], []>} : vector<1x32xf32>, vector<8x32xf32>, vector<1x8xf32> -> vector<1x8xf32>
    %c0_i32 = arith.constant 0 : i32
    %10 = arith.cmpi eq, %arg1, %c0_i32 : i32
    %11 = arith.extui %10 : i1 to i32
    %c0_i32_8 = arith.constant 0 : i32
    %12 = arith.cmpi ne, %11, %c0_i32_8 : i32
    scf.if %12 {
      %cst_13 = arith.constant 0.000000e+00 : f32
      %16 = vector.broadcast %cst_13 : f32 to vector<1x8xf32>
      %c0_14 = arith.constant 0 : index
      %c0_15 = arith.constant 0 : index
      %17 = vector.load %arg5[%c0_14, %c0_15] : memref<1x8xf32, #tpu.memory_space<vmem>>, vector<1x8xf32>
      tpu.vector_store %arg5[%c0_14, %c0_15], %16 {strides = array<i32>} : memref<1x8xf32, #tpu.memory_space<vmem>>, vector<1x8xf32>,
    } else {
    }
    %c0_9 = arith.constant 0 : index
    %c0_10 = arith.constant 0 : index
    %13 = vector.load %arg5[%c0_9, %c0_10] : memref<1x8xf32, #tpu.memory_space<vmem>>, vector<1x8xf32>
    %14 = arith.addf %13, %9 : vector<1x8xf32>
    %c0_11 = arith.constant 0 : index
    %c0_12 = arith.constant 0 : index
    %15 = vector.load %arg5[%c0_11, %c0_12] : memref<1x8xf32, #tpu.memory_space<vmem>>, vector<1x8xf32>
    tpu.vector_store %arg5[%c0_11, %c0_12], %14 {strides = array<i32>} : memref<1x8xf32, #tpu.memory_space<vmem>>, vector<1x8xf32>,
    return
  }
  func.func @transform_0(%arg0: i32, %arg1: i32) -> (i32, i32) {
    %c0_i32 = arith.constant 0 : i32
    %c0_i32_0 = arith.constant 0 : i32
    return %arg0, %c0_i32 : i32, i32
  }
  func.func @transform_1(%arg0: i32, %arg1: i32) -> (i32, i32) {
    %c0_i32 = arith.constant 0 : i32
    %c0_i32_0 = arith.constant 0 : i32
    return %arg1, %c0_i32 : i32, i32
  }
  func.func @transform_2(%arg0: i32, %arg1: i32) -> (i32, i32) {
    %c0_i32 = arith.constant 0 : i32
    %c0_i32_0 = arith.constant 0 : i32
    return %c0_i32, %arg1 : i32, i32
  }
  func.func @transform_3(%arg0: i32, %arg1: i32) -> (i32, i32) {
    %c0_i32 = arith.constant 0 : i32
    %c0_i32_0 = arith.constant 0 : i32
    return %arg0, %c0_i32 : i32, i32
  }
}

</mosaic_0001>

<bundles_post_ra>
// kernel: tpu_custom_call.1
= control target key start
LH: loop header
LB: loop body
LE: loop exit
PB: predicated region body
PF: predicated region fallthrough
CT: control target
= control target key end

     0   :  { %vm20_vm0 = vcmask 130048   ;;  %v266_v1 = vmov 0.0   ;;  %vm267_vm1 = vmmov 0   ;;  %s315_s0 = inlined_call_operand.vmem [shape: f32[8,16], index: 0, kind: input, shape index: {}]   ;;  %s316_s1 = inlined_call_operand.vmem [shape: f32[32,16], index: 1, kind: input, shape index: {}]   ;;  %s317_s2 = inlined_call_operand.vmem [shape: f32[1,32], index: 2, kind: input, shape index: {}]   ;;  %s318_s3 = inlined_call_operand.hbm [shape: f32[1,8], index: 3, kind: output, shape index: {}]  }
   0x1   :  { %v19_v0 = vld [vmem:[%s316_s1 + $0x18] sm:$0xff]  ;;  %225 = vmatprep.subr.mxu0 %v266_v1  ;;  %233 = vmatprep.mubr.msk.f32.mxu0 %vm267_vm1, %v266_v1 }
   0x2   :  { %8 = vsyncpa [#allocation3], 0  ;;  %226 = vmatpush3.xpose.msk.msra.mxu0 %vm20_vm0, %v19_v0  ;;  %236 = vmatprep.subr.mxu1 %v266_v1  ;;  %v18_v2 = vld [vmem:[%s316_s1 + $0x10] sm:$0xff]  ;;  %v17_v3 = vld [vmem:[%s316_s1 + $0x8] sm:$0xff]  ;;  %vm110_vm3 = vcmask 261120   ;;  %vm191_vm4 = vcmask 57344  }
   0x3   :  { %227 = vmatprep.subr.mxu0 %v266_v1  ;;  %238 = vmatprep.mubr.msk.f32.mxu1 %vm267_vm1, %v266_v1  ;;  %v16_v4 = vld [vmem:[%s316_s1] sm:$0xff]  ;;  %192 = vst.msk [vmem:[#allocation2] sm:$0x1] %vm191_vm4, %v266_v1  ;;  %s268_s1 = smov [#allocation2]  }
   0x4   :  { %v15_v5 = vld [vmem:[%s315_s0] sm:$0xff]  ;;  %s203_s24 = sshll.u32 %s268_s1, 4  ;;  %s204_s24 = int_to_ptr.vmem [resolvable:$true] %s203_s24 }
   0x5   :  { %v109_v10 = vld [vmem:[%s317_s2] sm:$0x1]  ;;  %s244_s0 = scalar_lea.vmem %s204_s24, 16  ;;  %s248_s25 = scalar_lea.vmem %s204_s24, 32 }
   0x6   :  { %228 = vmatpush3.xpose.msk.msra.mxu0 %vm20_vm0, %v18_v2  ;;  %p245_p0 = scmp.ne.s32.totalorder %s204_s24, %s244_s0  ;;  %p249_p1 = scmp.lt.s32.totalorder %s204_s24, %s204_s24 }
   0x7   :  { %229 = vmatprep.subr.mxu0 %v266_v1  ;;  %p250_p2 = scmp.lt.s32.totalorder %s248_s25, %s244_s0 }
   0x9   :  { %p251_p3 = por %p250_p2, %p249_p1 }
   0xa   :  { %230 = vmatpush3.xpose.msk.msra.mxu0 %vm20_vm0, %v17_v3  ;;  %v193_v11 = vld [vmem:[#allocation2] sm:$0x1] }
   0xb   :  { %231 = vmatprep.subr.mxu0 %v266_v1  ;;  %p252_p4 = pnand %p251_p3, %p245_p0 }
   0xe   :  { %232 = vmatpush3.xpose.msk.msra.mxu0 %vm20_vm0, %v16_v4 }
  0x11   :  { %234 = vmatmul.mubr.msk.f32.vlgmr.msra.gmra.mxu0 %vm20_vm0, %v15_v5 }
  0xd1   :  { %v102_v6 = vpop.f32.mrf.mxu0 }
  0xd2   :  { %vm106_vm2 = vcmp.gt.f32.partialorder %v102_v6, 0.0  ;;  %v107_v7 = vmul.f32 0.01, %v102_v6 }
  0xd3   :  { %v235_v8 = vpop.f32.mrf.mxu0 }
  0xd4   :  { %v108_v9 = vsel %vm106_vm2, %v102_v6, %v107_v7 }
  0xd5   :  { %237 = vmatpush3.xpose.msk.msra.mxu1 %vm110_vm3, %v108_v9 }
  0xd8   :  { %239 = vmatmul.mubr.msk.f32.vlgmr.msra.gmra.mxu1 %vm110_vm3, %v109_v10 }
 0x198   :  { %v183_v12 = vpop.f32.mrf.mxu1 }
 0x199   :  { %v194_v13 = vadd.f32 %v193_v11, %v183_v12 }
 0x19a   :  { %v240_v14 = vpop.f32.mrf.mxu1 }
 0x19b   :  { %196 = vst.msk [vmem:[#allocation2] sm:$0x1] %vm191_vm4, %v194_v13 }
 0x19c   :  { %255 = shalt.err (!%p252_p4)
}
 0x19d   :  { %206 = dma.vmem_to_hbm [thread:$0]  %s204_s24, 16, %s318_s3, [#allocation3]  }
 0x19e   :  { %264 = dma.done.wait [#allocation3], 16  }
 0x19f   :  { %265 = vsyncadd [#allocation3], 4294967280 }
 0x1a0   :  { %210 = vsyncpa [#allocation3], 1 }

</bundles_post_ra>
